<compile_context>
chip_gen: v7x
topology: tpu7x:2x2x1
jax: 0.10.0
libtpu: 0.0.40
codegen_flags: <defaults>
</compile_context>

<pallas_src>
import math

import jax
import jax.numpy as jnp
from jax.experimental import pallas as pl
from jax.experimental.pallas import tpu as pltpu


def _round_up(v: int, m: int) -> int:
    return (v + m - 1) // m * m


# ---------------------------------------------------------------- kernels ---

def _discri_kernel_dout1(x_ref, w0_ref, b0_ref, w1_ref, b1_ref, o_ref):
    # x arrives f32 (single HBM pass); cast to bf16 on the VPU just before the MXU.
    x_bf = x_ref[...].astype(jnp.bfloat16)
    h = jnp.dot(x_bf, w0_ref[...], preferred_element_type=jnp.float32)
    h = jnp.maximum(h + b0_ref[...], 0.0)                   # (TM, H) + (1, H), ReLU on VPU
    # Output layer (Dout == 1): VPU multiply + XLU lane-reduce instead of an
    # N=1 MXU matmul (which would use 1 of 128/256 output columns).
    y = jnp.sum(h * w1_ref[...], axis=-1, keepdims=True)    # (TM, H)*(1, H) -> (TM, 1)
    y = y + b1_ref[0, 0]                                     # scalar bias from SMEM
    o_ref[...] = y.astype(o_ref.dtype)


def _discri_kernel_general(x_ref, w0_ref, b0_ref, w1_ref, b1_ref, o_ref):
    # Fallback path for dim_output > 1 (DisCri only hits this when dim_output > 2).
    x_bf = x_ref[...].astype(jnp.bfloat16)
    h = jnp.dot(x_bf, w0_ref[...], preferred_element_type=jnp.float32)
    h = jnp.maximum(h + b0_ref[...], 0.0)
    y = jnp.dot(h, w1_ref[...], preferred_element_type=jnp.float32) + b1_ref[...]
    o_ref[...] = y.astype(o_ref.dtype)


# ---------------------------------------------------------------- wrapper ---

def _choose_tm(B: int, Din: int, H: int, Dout: int,
               budget_bytes: int = 32 << 20, cap: int = 8192) -> int:
    """Pick the batch tile from a per-grid-step VMEM budget (lane-padded)."""
    lane = 128
    per_row = (_round_up(Din, lane) * 4 * 2            # f32 x tile, double-buffered
               + _round_up(H, lane) * 4                # f32 hidden slab
               + _round_up(max(Dout, 1), lane) * 4 * 2)  # f32 output, double-buffered
    tm = max(16, (budget_bytes // per_row) // 16 * 16)
    tm = min(tm, cap)
    if tm >= B:
        return B                                       # single (possibly ragged) block
    return tm


def discri_forward(x, w0, b0, w1, b1):
    """Forward pass of DisCri. Weights stored as (in, out); biases as (1, out)."""
    B, Din = x.shape
    H = w0.shape[1]
    Dout = w1.shape[1]
    out_dtype = x.dtype

    # Only W0 is pre-cast (tiny, VMEM-resident); x stays f32 and is cast in-kernel.
    w0_lp = w0.astype(jnp.bfloat16)

    TM = _choose_tm(B, Din, H, Dout)
    grid = (pl.cdiv(B, TM),)

    # Explicit scoped-VMEM budget: actual per-step tile bytes + resident weights + margin.
    lane = 128
    per_step = TM * (_round_up(Din, lane) * 4 * 2
                     + _round_up(H, lane) * 4
                     + _round_up(max(Dout, 1), lane) * 4 * 2)
    weights_bytes = (_round_up(Din, 16) * _round_up(H, lane) * 2
                     + _round_up(H, lane) * 4 * 2
                     + _round_up(H, 8) * _round_up(max(Dout, lane), lane) * 4) * 2
    vmem_limit = min(per_step + weights_bytes + (4 << 20), 56 << 20)

    compiler_params = pltpu.CompilerParams(
        dimension_semantics=("parallel",),
        vmem_limit_bytes=int(vmem_limit),
    )

    cost = pl.CostEstimate(
        flops=2 * B * Din * H + 2 * B * H * Dout,
        transcendentals=0,
        bytes_accessed=(B * Din * 4 + Din * H * 2 + H * 4
                        + H * Dout * 4 + Dout * 4 + B * Dout * 4),
    )

    if Dout == 1:
        # w1 presented as a lane-dense (1, H) row for the VPU/XLU path.
        w1_row = w1.T                                   # (1, H)
        out = pl.pallas_call(
            _discri_kernel_dout1,
            out_shape=jax.ShapeDtypeStruct((B, 1), out_dtype),
            grid=grid,
            in_specs=[
                pl.BlockSpec((TM, Din), lambda i: (i, 0)),          # x: tiled over batch
                pl.BlockSpec((Din, H), lambda i: (0, 0)),           # W0: resident
                pl.BlockSpec((1, H), lambda i: (0, 0)),             # b0: resident
                pl.BlockSpec((1, H), lambda i: (0, 0)),             # W1 row: resident
                pl.BlockSpec(memory_space=pltpu.MemorySpace.SMEM),  # b1 scalar
            ],
            out_specs=pl.BlockSpec((TM, 1), lambda i: (i, 0)),
            compiler_params=compiler_params,
            cost_estimate=cost,
        )(x, w0_lp, b0, w1_row, b1)
    else:
        out = pl.pallas_call(
            _discri_kernel_general,
            out_shape=jax.ShapeDtypeStruct((B, Dout), out_dtype),
            grid=grid,
            in_specs=[
                pl.BlockSpec((TM, Din), lambda i: (i, 0)),
                pl.BlockSpec((Din, H), lambda i: (0, 0)),
                pl.BlockSpec((1, H), lambda i: (0, 0)),
                pl.BlockSpec((H, Dout), lambda i: (0, 0)),
                pl.BlockSpec((1, Dout), lambda i: (0, 0)),
            ],
            out_specs=pl.BlockSpec((TM, Dout), lambda i: (i, 0)),
            compiler_params=compiler_params,
            cost_estimate=cost,
        )(x, w0_lp, b0, w1, b1)

    return out


# ------------------------------------------------------------------- init ---

def init_params(key, dim_input, dim_hidden, dim_output):
    """Deterministic parameter init mirroring DisCri.__init__:
    xavier_uniform_ on weights, PyTorch-default uniform(+-1/sqrt(fan_in)) on biases."""
    k0, k1, k2, k3 = jax.random.split(key, 4)

    def xavier(k, fan_in, fan_out):
        bound = math.sqrt(6.0 / (fan_in + fan_out))
        # Stored as (in, out): same distribution as PyTorch's (out, in), transposed layout.
        return jax.random.uniform(k, (fan_in, fan_out), jnp.float32, -bound, bound)

    def bias(k, fan_in, fan_out):
        bound = 1.0 / math.sqrt(fan_in)
        return jax.random.uniform(k, (1, fan_out), jnp.float32, -bound, bound)

    w0 = xavier(k0, dim_input, dim_hidden)
    b0 = bias(k1, dim_input, dim_hidden)
    w1 = xavier(k2, dim_hidden, dim_output)
    b1 = bias(k3, dim_hidden, dim_output)
    return w0, b0, w1, b1


if __name__ == "__main__":
    key = jax.random.PRNGKey(0)
    kx, kp = jax.random.split(key)

    batch = 12           # deliberately not a multiple of 8/16 to exercise the ragged block
    dim_input = 32
    dim_hidden = 32
    dim_output = 1       # DisCri forces dim_output=1 when dim_output <= 2

    x = jax.random.normal(kx, (batch, dim_input), jnp.float32)
    w0, b0, w1, b1 = init_params(kp, dim_input, dim_hidden, dim_output)

    out = discri_forward(x, w0, b0, w1, b1)
    out = jax.block_until_ready(out)

    # Pure-JAX reference using the same bf16-input / f32-accumulate numerics.
    x_bf = x.astype(jnp.bfloat16)
    w0_bf = w0.astype(jnp.bfloat16)
    h_ref = jnp.maximum(
        jnp.dot(x_bf, w0_bf, preferred_element_type=jnp.float32) + b0, 0.0)
    ref = h_ref @ w1 + b1

    assert out.shape == (batch, dim_output)
    assert jnp.allclose(out, ref, atol=1e-3, rtol=1e-3)

    print("KERNEL_OK")
</pallas_src>

<mosaic_0001>
module attributes {stable_mosaic.version = 11 : i64} {
  func.func @_discri_kernel_dout1(%arg0: i32, %arg1: memref<12x32xf32, #tpu.memory_space<vmem>>, %arg2: memref<32x32xbf16, #tpu.memory_space<vmem>>, %arg3: memref<1x32xf32, #tpu.memory_space<vmem>>, %arg4: memref<1x32xf32, #tpu.memory_space<vmem>>, %arg5: memref<1x1xf32, #tpu.memory_space<smem>>, %arg6: memref<12x1xf32, #tpu.memory_space<vmem>>) attributes {dimension_semantics = [#tpu.dimension_semantics<parallel>], iteration_bounds = array<i64: 1>, scalar_prefetch = 0 : i64, scratch_operands = 0 : i64, tpu.core_type = #tpu.core_type<tc>, window_params = [{transform_indices = @transform_0, window_bounds = array<i64: 12, 32>}, {pipeline_mode = #tpu.pipeline_mode<synchronous>, transform_indices = @transform_1, window_bounds = array<i64: 32, 32>}, {pipeline_mode = #tpu.pipeline_mode<synchronous>, transform_indices = @transform_2, window_bounds = array<i64: 1, 32>}, {pipeline_mode = #tpu.pipeline_mode<synchronous>, transform_indices = @transform_3, window_bounds = array<i64: 1, 32>}, {transform_indices = @transform_4, window_bounds = array<i64: 1, 1>}, {transform_indices = @transform_5, window_bounds = array<i64: 12, 1>}]} {
    %c0 = arith.constant 0 : index
    %c0_0 = arith.constant 0 : index
    %0 = vector.load %arg1[%c0, %c0_0] : memref<12x32xf32, #tpu.memory_space<vmem>>, vector<12x32xf32>
    %1 = arith.truncf %0 : vector<12x32xf32> to vector<12x32xbf16>
    %c0_1 = arith.constant 0 : index
    %c0_2 = arith.constant 0 : index
    %2 = vector.load %arg2[%c0_1, %c0_2] : memref<32x32xbf16, #tpu.memory_space<vmem>>, vector<32x32xbf16>
    %cst = arith.constant dense<0.000000e+00> : vector<12x32xf32>
    %3 = tpu.matmul %1, %2, %cst {dimension_numbers = #tpu.dot_dimension_numbers<[1], [0], [0], [1], [0, 0, 1, 1], [], []>} : vector<12x32xbf16>, vector<32x32xbf16>, vector<12x32xf32> -> vector<12x32xf32>
    %c0_3 = arith.constant 0 : index
    %c0_4 = arith.constant 0 : index
    %4 = vector.load %arg3[%c0_3, %c0_4] : memref<1x32xf32, #tpu.memory_space<vmem>>, vector<1x32xf32>
    %5 = vector.broadcast %4 : vector<1x32xf32> to vector<12x32xf32>
    %6 = arith.addf %3, %5 : vector<12x32xf32>
    %cst_5 = arith.constant 0.000000e+00 : f32
    %7 = vector.broadcast %cst_5 : f32 to vector<12x32xf32>
    %8 = arith.maximumf %6, %7 : vector<12x32xf32>
    %c0_6 = arith.constant 0 : index
    %c0_7 = arith.constant 0 : index
    %9 = vector.load %arg4[%c0_6, %c0_7] : memref<1x32xf32, #tpu.memory_space<vmem>>, vector<1x32xf32>
    %10 = vector.broadcast %9 : vector<1x32xf32> to vector<12x32xf32>
    %11 = arith.mulf %8, %10 : vector<12x32xf32>
    %cst_8 = arith.constant dense<0.000000e+00> : vector<12xf32>
    %12 = vector.multi_reduction <add>, %11, %cst_8 [1] : vector<12x32xf32> to vector<12xf32>
    %13 = vector.shape_cast %12 : vector<12xf32> to vector<12x1xf32>
    %c0_9 = arith.constant 0 : index
    %c0_10 = arith.constant 0 : index
    %14 = memref.load %arg5[%c0_9, %c0_10] : memref<1x1xf32, #tpu.memory_space<smem>>
    %15 = vector.broadcast %14 : f32 to vector<12x1xf32>
    %16 = arith.addf %13, %15 : vector<12x1xf32>
    %c0_11 = arith.constant 0 : index
    %c0_12 = arith.constant 0 : index
    %17 = vector.load %arg6[%c0_11, %c0_12] : memref<12x1xf32, #tpu.memory_space<vmem>>, vector<12x1xf32>
    tpu.vector_store %arg6[%c0_11, %c0_12], %16 {strides = array<i32>} : memref<12x1xf32, #tpu.memory_space<vmem>>, vector<12x1xf32>,
    return
  }
  func.func @transform_0(%arg0: i32) -> (i32, i32) {
    %c0_i32 = arith.constant 0 : i32
    %c0_i32_0 = arith.constant 0 : i32
    return %arg0, %c0_i32 : i32, i32
  }
  func.func @transform_1(%arg0: i32) -> (i32, i32) {
    %c0_i32 = arith.constant 0 : i32
    %c0_i32_0 = arith.constant 0 : i32
    %c0_i32_1 = arith.constant 0 : i32
    return %c0_i32, %c0_i32_0 : i32, i32
  }
  func.func @transform_2(%arg0: i32) -> (i32, i32) {
    %c0_i32 = arith.constant 0 : i32
    %c0_i32_0 = arith.constant 0 : i32
    %c0_i32_1 = arith.constant 0 : i32
    return %c0_i32, %c0_i32_0 : i32, i32
  }
  func.func @transform_3(%arg0: i32) -> (i32, i32) {
    %c0_i32 = arith.constant 0 : i32
    %c0_i32_0 = arith.constant 0 : i32
    %c0_i32_1 = arith.constant 0 : i32
    return %c0_i32, %c0_i32_0 : i32, i32
  }
  func.func @transform_4(%arg0: i32) -> (i32, i32) {
    %c0_i32 = arith.constant 0 : i32
    %c0_i32_0 = arith.constant 0 : i32
    %c0_i32_1 = arith.constant 0 : i32
    return %c0_i32, %c0_i32_0 : i32, i32
  }
  func.func @transform_5(%arg0: i32) -> (i32, i32) {
    %c0_i32 = arith.constant 0 : i32
    %c0_i32_0 = arith.constant 0 : i32
    return %arg0, %c0_i32 : i32, i32
  }
}

</mosaic_0001>

<bundles_post_ra>
// kernel: tpu_custom_call.1
= control target key start
LH: loop header
LB: loop body
LE: loop exit
PB: predicated region body
PF: predicated region fallthrough
CT: control target
= control target key end

     0   :  { %11 = vsyncpa [#allocation4], 0  ;;  %s304_s0 = inlined_call_operand.hbm [shape: f32[12,32], index: 0, kind: input, shape index: {}]   ;;  %s305_s1 = inlined_call_operand.hbm [shape: bf16[32,32], index: 1, kind: input, shape index: {}]   ;;  %s306_s2 = inlined_call_operand.vmem [shape: f32[1,32], index: 2, kind: input, shape index: {}]   ;;  %s307_s3 = inlined_call_operand.vmem [shape: f32[1,32], index: 3, kind: input, shape index: {}]   ;;  %s308_s4 = inlined_call_operand.<no memory space> [shape: f32[1,1], index: 4, kind: input, shape index: {}]   ;;  %s309_s5 = inlined_call_operand.vmem [shape: f32[12,1], index: 5, kind: output, shape index: {}]  }
   0x1   :  { %12 = vsyncpa [#allocation6], 0  ;;  %s227_s18 = smov [#allocation3]   ;;  %s179_s22 = scalar_lea.hbm %s304_s0, 256 }
   0x2   :  { %s18_s19 = sshll.u32 %s227_s18, 4  ;;  %p180_p0 = scmp.ne.s32.totalorder %s304_s0, %s179_s22  ;;  %s19_s19 = int_to_ptr.vmem [resolvable:$true] %s18_s19 }
   0x3   :  { %p183_p1 = scmp.lt.u32.totalorder %s179_s22, %s304_s0 }
   0x5   :  { %p185_p2 = pnand %p183_p1, %p180_p0 }
   0x7   :  { %188 = shalt.err (!%p185_p2)
}
   0x8   :  { %s189_s27 = scalar_lea.vmem %s19_s19, 256  ;;  %p194_p4 = scmp.lt.s32.totalorder %s19_s19, %s19_s19 }
   0x9   :  { %p190_p3 = scmp.ne.s32.totalorder %s19_s19, %s189_s27  ;;  %p195_p5 = scmp.lt.s32.totalorder %s189_s27, %s189_s27 }
   0xb   :  { %p196_p6 = por %p195_p5, %p194_p4 }
   0xd   :  { %p197_p7 = pnand %p196_p6, %p190_p3 }
   0xf   :  { %200 = shalt.err (!%p197_p7)
}
  0x10   :  { %s228_s28 = smov 128   ;;  %s229_s29 = smov 8  }
  0x11   :  { %24 = dma.hbm_to_vmem [thread:$0]  %s304_s0, 256, %s19_s19, [#allocation4], %s228_s28, %s228_s28, %s229_s29  }
  0x12   :  { %s230_s7 = smov [#allocation5]   ;;  %s201_s11 = scalar_lea.hbm %s305_s1, 256 }
  0x13   :  { %s30_s8 = sshll.u32 %s230_s7, 4  ;;  %p202_p8 = scmp.ne.s32.totalorder %s305_s1, %s201_s11  ;;  %s31_s8 = int_to_ptr.vmem [resolvable:$true] %s30_s8 }
  0x14   :  { %p205_p9 = scmp.lt.u32.totalorder %s201_s11, %s305_s1 }
  0x16   :  { %p207_p10 = pnand %p205_p9, %p202_p8 }
  0x18   :  { %210 = shalt.err (!%p207_p10)
}
  0x19   :  { %s211_s16 = scalar_lea.vmem %s31_s8, 256  ;;  %p216_p12 = scmp.lt.s32.totalorder %s31_s8, %s31_s8 }
  0x1a   :  { %p212_p11 = scmp.ne.s32.totalorder %s31_s8, %s211_s16  ;;  %p217_p13 = scmp.lt.s32.totalorder %s211_s16, %s211_s16 }
  0x1c   :  { %p218_p0 = por %p217_p13, %p216_p12 }
  0x1e   :  { %p219_p1 = pnand %p218_p0, %p212_p11 }
  0x20   :  { %222 = shalt.err (!%p219_p1)
}
  0x21   :  { %s231_s0 = smov 64   ;;  %s232_s17 = smov 4  }
  0x22   :  { %36 = dma.hbm_to_vmem [thread:$0]  %s305_s1, 256, %s31_s8, [#allocation6], %s231_s0, %s231_s0, %s232_s17  }
  0x23   :  { %223 = dma.done.wait [#allocation4], 256  }
  0x24   :  { %224 = vsyncadd [#allocation4], 4294967040 }
  0x25   :  { %225 = dma.done.wait [#allocation6], 256  }
  0x26   :  { %226 = vsyncadd [#allocation6], 4294967040  ;;  %v233_v0 = vmov 0.0   ;;  %vm234_vm0 = vmmov 0   ;;  %v177_v1 = vld [vmem:[#allocation5] sm:$0xff]   ;;  %v178_v2 = vld [vmem:[#allocation5 + $0x8] sm:$0xff]   ;;  %v140_v20 = vstv %s308_s4 }
  0x27   :  { %161 = vmatprep.subr.bf16.mxu0 %v233_v0  ;;  %165 = vmatprep.mubr.msk.bf16.mxu0 %vm234_vm0, %v233_v0  ;;  %v50_v3 = vld [vmem:[#allocation3] sm:$0xff]  ;;  %v51_v4 = vld [vmem:[#allocation3 + $0x8] sm:$0xf]  ;;  %vm76_vm1 = vcmask 261120   ;;  %vm135_vm2 = vcmask 257024   ;;  %vm143_vm3 = vcmask 7168  }
  0x28   :  { %162 = vmatpush3.bf16.msra.mxu0 %v177_v1  ;;  %v52_v5 = vpack.c.bf16 %v51_v4, %v50_v3  ;;  %v153_v6 = vld [vmem:[%s306_s2] ss:$0 sm:$0xff]  ;;  %vm145_vm4 = vcmask 3072  }
  0x29   :  { %163 = vmatprep.subr.bf16.mxu0 %v233_v0  ;;  %v157_v11 = vld [vmem:[%s307_s3] ss:$0 sm:$0xff] }
  0x2c   :  { %164 = vmatpush3.bf16.msra.mxu0 %v178_v2 }
  0x2f   :  { %166 = vmatmul.mubr.msk.bf16.vlgmr.msra.gmra.mrb[0].mxu0 %vm76_vm1, %v52_v5 }
 0x102   :  { %v114_v7 = vpop.f32.mrb[0].mxu0 }
 0x103   :  { %v115_v8 = vadd.f32 %v153_v6, %v114_v7  ;;  %v167_v9 = vpop.f32.mrb[1].mxu0 }
 0x104   :  { %v117_v10 = vpop.f32.mrb[2].mxu0 }
 0x105   :  { %v121_v12 = vmax.f32 %v115_v8, 0.0  ;;  %v118_v13 = vadd.f32 %v153_v6, %v117_v10  ;;  %v168_v14 = vpop.f32.mrb[3].mxu0 }
 0x107   :  { %v122_v15 = vmax.f32 %v118_v13, 0.0  ;;  %v130_v16 = vmul.f32 %v157_v11, %v121_v12 }
 0x109   :  { %v132_v17 = vsel %vm76_vm1, %v130_v16, 0.0  ;;  %v131_v18 = vmul.f32 %v157_v11, %v122_v15 }
 0x10a   :  { %133 = vadd.xlane.f32.xlu0 %v132_v17 }
 0x10b   :  { %v136_v19 = vsel %vm135_vm2, %v131_v18, 0.0 }
 0x10e   :  { %137 = vadd.xlane.f32.xlu0 %v136_v19 }
 0x197   :  { %v134_v21 = vpop.xlane.xlu0 %133 }
 0x198   :  { %v141_v22 = vadd.f32 %v140_v20, %v134_v21 }
 0x19a   :  { %144 = vst.msk [vmem:[%s309_s5] sm:$0xff] %vm143_vm3, %v141_v22 }
 0x19b   :  { %v138_v23 = vpop.xlane.xlu0 %137 }
 0x19c   :  { %v142_v24 = vadd.f32 %v140_v20, %v138_v23 }
 0x19e   :  { %146 = vst.msk [vmem:[%s309_s5 + $0x8] sm:$0xf] %vm145_vm4, %v142_v24 }
 0x19f   :  { %151 = vsyncpa [#allocation4], 1 }
 0x1a0   :  { %152 = vsyncpa [#allocation6], 1 }

</bundles_post_ra>
